<compile_context>
chip_gen: v6e
topology: v6e:2x2x1
jax: 0.10.0
libtpu: 0.0.40
codegen_flags: <defaults>
</compile_context>

<pallas_src>
import functools

import jax
import jax.numpy as jnp
from jax.experimental import pallas as pl
from jax.experimental.pallas import tpu as pltpu


def _ncc_map_kernel(x_ref, y_ref, m_ref, ncc_ref, *, eps):
    # Load full slabs; cast to f32 in-kernel (no-op when inputs already f32).
    x = x_ref[...].astype(jnp.float32)
    y = y_ref[...].astype(jnp.float32)
    m = m_ref[...].astype(jnp.float32)

    # x = x * mask ; y = y * mask
    xm = x * m
    ym = y * m

    # Masked means: one divide, two multiplies.
    valid_count = jnp.sum(m)
    inv_count = 1.0 / valid_count
    x_mean = jnp.sum(xm) * inv_count
    y_mean = jnp.sum(ym) * inv_count

    # x = (x - x_mean) * mask ; y = (y - y_mean) * mask
    xc = (xm - x_mean) * m
    yc = (ym - y_mean) * m

    # ncc = (dev_xy + eps) / (sqrt(dev_xx * dev_yy) + eps)
    #     = (dev_xy + eps) / (|dev_xy| + eps)
    dev_xy = xc * yc
    ncc_ref[...] = ((dev_xy + eps) / (jnp.abs(dev_xy) + eps)).astype(ncc_ref.dtype)


def ncc_metric_map_forward(output, mask, ground_truth, eps=1e-8):
    """Pallas equivalent of NCC_metric_map.forward.

    Args:
      output:       (C, H, W) float tensor.
      mask:         (C, H, W) float tensor (0/1 valid mask).
      ground_truth: (C, H, W) float tensor.

    Returns:
      (ncc, output, ground_truth) matching the PyTorch module.
    """
    shape = output.shape
    total = output.size

    # Lane/sublane-dense slab: sublane dim 8, lane dim a multiple of 128.
    slab = 8 * 128
    pad = (-total) % slab
    padded = total + pad
    lane = padded // 8

    def to_slab(a):
        flat = a.reshape(-1)
        if pad:
            # Zero padding is exact: padded mask entries are 0, so they do not
            # contribute to valid_count or the masked sums; padded map values
            # are sliced off below.
            flat = jnp.pad(flat, (0, pad))
        return flat.reshape(8, lane)

    x2 = to_slab(output)
    y2 = to_slab(ground_truth)
    m2 = to_slab(mask)

    vmem_spec = pl.BlockSpec(memory_space=pltpu.MemorySpace.VMEM)

    ncc2 = pl.pallas_call(
        functools.partial(_ncc_map_kernel, eps=eps),
        out_shape=jax.ShapeDtypeStruct((8, lane), jnp.float32),
        in_specs=[vmem_spec, vmem_spec, vmem_spec],
        out_specs=vmem_spec,
    )(x2, y2, m2)

    ncc_flat = ncc2.reshape(-1)
    if pad:
        ncc_flat = ncc_flat[:total]
    ncc = ncc_flat.reshape(shape)
    return ncc, output, ground_truth


def _reference_ncc(output, mask, ground_truth, eps=1e-8):
    # Pure-JAX reference reproducing the PyTorch math exactly (with the sqrt).
    x = output * mask
    y = ground_truth * mask
    vc = jnp.sum(mask)
    x_mean = jnp.sum(x) / vc
    y_mean = jnp.sum(y) / vc
    xc = (x - x_mean) * mask
    yc = (y - y_mean) * mask
    return (xc * yc + eps) / (jnp.sqrt((xc * xc) * (yc * yc)) + eps)


if __name__ == "__main__":
    key = jax.random.PRNGKey(0)
    k1, k2, k3 = jax.random.split(key, 3)

    C, H, W = 4, 16, 16
    output = jax.random.normal(k1, (C, H, W), dtype=jnp.float32)
    ground_truth = jax.random.normal(k2, (C, H, W), dtype=jnp.float32)
    mask = (jax.random.uniform(k3, (C, H, W)) > 0.3).astype(jnp.float32)

    ncc, out_pass, gt_pass = ncc_metric_map_forward(output, mask, ground_truth)
    jax.block_until_ready(ncc)

    ref = _reference_ncc(output, mask, ground_truth)
    assert ncc.shape == (C, H, W)
    assert jnp.allclose(ncc, ref, atol=1e-5, rtol=1e-5)
    assert jnp.array_equal(out_pass, output)
    assert jnp.array_equal(gt_pass, ground_truth)

    print("KERNEL_OK")
</pallas_src>

<mosaic_0001>
module attributes {stable_mosaic.version = 11 : i64} {
  func.func @_ncc_map_kernel(%arg0: memref<8x128xf32, #tpu.memory_space<vmem>>, %arg1: memref<8x128xf32, #tpu.memory_space<vmem>>, %arg2: memref<8x128xf32, #tpu.memory_space<vmem>>, %arg3: memref<8x128xf32, #tpu.memory_space<vmem>>) attributes {dimension_semantics = [], scalar_prefetch = 0 : i64, scratch_operands = 0 : i64, tpu.core_type = #tpu.core_type<tc>} {
    %c0 = arith.constant 0 : index
    %c0_0 = arith.constant 0 : index
    %0 = vector.load %arg0[%c0, %c0_0] : memref<8x128xf32, #tpu.memory_space<vmem>>, vector<8x128xf32>
    %c0_1 = arith.constant 0 : index
    %c0_2 = arith.constant 0 : index
    %1 = vector.load %arg1[%c0_1, %c0_2] : memref<8x128xf32, #tpu.memory_space<vmem>>, vector<8x128xf32>
    %c0_3 = arith.constant 0 : index
    %c0_4 = arith.constant 0 : index
    %2 = vector.load %arg2[%c0_3, %c0_4] : memref<8x128xf32, #tpu.memory_space<vmem>>, vector<8x128xf32>
    %3 = arith.mulf %0, %2 : vector<8x128xf32>
    %4 = arith.mulf %1, %2 : vector<8x128xf32>
    %5 = vector.shape_cast %2 : vector<8x128xf32> to vector<1x8x128xf32>
    %cst = arith.constant dense<0.000000e+00> : vector<1xf32>
    %6 = vector.multi_reduction <add>, %5, %cst [1, 2] : vector<1x8x128xf32> to vector<1xf32>
    %7 = vector.shape_cast %6 : vector<1xf32> to vector<1x1x1xf32>
    %8 = vector.extract %7[0, 0, 0] : f32 from vector<1x1x1xf32>
    %cst_5 = arith.constant 1.000000e+00 : f32
    %9 = arith.divf %cst_5, %8 : f32
    %10 = vector.shape_cast %3 : vector<8x128xf32> to vector<1x8x128xf32>
    %cst_6 = arith.constant dense<0.000000e+00> : vector<1xf32>
    %11 = vector.multi_reduction <add>, %10, %cst_6 [1, 2] : vector<1x8x128xf32> to vector<1xf32>
    %12 = vector.shape_cast %11 : vector<1xf32> to vector<1x1x1xf32>
    %13 = vector.extract %12[0, 0, 0] : f32 from vector<1x1x1xf32>
    %14 = arith.mulf %13, %9 : f32
    %15 = vector.shape_cast %4 : vector<8x128xf32> to vector<1x8x128xf32>
    %cst_7 = arith.constant dense<0.000000e+00> : vector<1xf32>
    %16 = vector.multi_reduction <add>, %15, %cst_7 [1, 2] : vector<1x8x128xf32> to vector<1xf32>
    %17 = vector.shape_cast %16 : vector<1xf32> to vector<1x1x1xf32>
    %18 = vector.extract %17[0, 0, 0] : f32 from vector<1x1x1xf32>
    %19 = arith.mulf %18, %9 : f32
    %20 = vector.broadcast %14 : f32 to vector<8x128xf32>
    %21 = arith.subf %3, %20 : vector<8x128xf32>
    %22 = arith.mulf %21, %2 : vector<8x128xf32>
    %23 = vector.broadcast %19 : f32 to vector<8x128xf32>
    %24 = arith.subf %4, %23 : vector<8x128xf32>
    %25 = arith.mulf %24, %2 : vector<8x128xf32>
    %26 = arith.mulf %22, %25 : vector<8x128xf32>
    %cst_8 = arith.constant 9.99999993E-9 : f32
    %27 = vector.broadcast %cst_8 : f32 to vector<8x128xf32>
    %28 = arith.addf %26, %27 : vector<8x128xf32>
    %29 = math.absf %26 : vector<8x128xf32>
    %cst_9 = arith.constant 9.99999993E-9 : f32
    %30 = vector.broadcast %cst_9 : f32 to vector<8x128xf32>
    %31 = arith.addf %29, %30 : vector<8x128xf32>
    %32 = arith.divf %28, %31 : vector<8x128xf32>
    %c0_10 = arith.constant 0 : index
    %c0_11 = arith.constant 0 : index
    %33 = vector.load %arg3[%c0_10, %c0_11] : memref<8x128xf32, #tpu.memory_space<vmem>>, vector<8x128xf32>
    tpu.vector_store %arg3[%c0_10, %c0_11], %32 {strides = array<i32>} : memref<8x128xf32, #tpu.memory_space<vmem>>, vector<8x128xf32>,
    return
  }
}

</mosaic_0001>

<bundles_post_ra>
// kernel: tpu_custom_call.1
= control target key start
LH: loop header
LB: loop body
LE: loop exit
PB: predicated region body
PF: predicated region fallthrough
CT: control target
= control target key end

     0   :  { %8 = vsyncpa [#allocation3], 0  ;;  %s254_s0 = inlined_call_operand.hbm [shape: f32[8,128], index: 0, kind: input, shape index: {}]   ;;  %s255_s1 = inlined_call_operand.hbm [shape: f32[8,128], index: 1, kind: input, shape index: {}]   ;;  %s256_s2 = inlined_call_operand.hbm [shape: f32[8,128], index: 2, kind: input, shape index: {}]   ;;  %s257_s3 = inlined_call_operand.hbm [shape: f32[8,128], index: 3, kind: output, shape index: {}]  }
   0x1   :  { %9 = vsyncpa [#allocation6], 0 }
   0x2   :  { %10 = vsyncpa [#allocation4], 0  ;;  %s218_s12 = smov [#allocation5]   ;;  %s219_s14 = smov [#allocation2]  }
   0x3   :  { %s27_s13 = sshll.u32 %s218_s12, 4  ;;  %s17_s15 = sshll.u32 %s219_s14, 4  ;;  %s28_s13 = int_to_ptr.vmem [resolvable:$true] %s27_s13  ;;  %s18_s15 = int_to_ptr.vmem [resolvable:$true] %s17_s15 }
   0x4   :  { %s140_s16 = scalar_lea.vmem %s28_s13, 128  ;;  %p145_p1 = scmp.lt.s32.totalorder %s28_s13, %s28_s13 }
   0x5   :  { %p141_p0 = scmp.ne.s32.totalorder %s28_s13, %s140_s16  ;;  %p146_p2 = scmp.lt.s32.totalorder %s140_s16, %s140_s16 }
   0x7   :  { %p147_p3 = por %p146_p2, %p145_p1 }
   0x9   :  { %p148_p4 = pnand %p147_p3, %p141_p0 }
   0xb   :  { %151 = shalt.err (!%p148_p4)
}
   0xc   :  { %30 = dma.hbm_to_vmem [thread:$0]  %s255_s1, 128, %s28_s13, [#allocation6]  }
   0xd   :  { %s160_s19 = scalar_lea.vmem %s18_s15, 128  ;;  %p165_p6 = scmp.lt.s32.totalorder %s18_s15, %s18_s15 }
   0xe   :  { %p161_p5 = scmp.ne.s32.totalorder %s18_s15, %s160_s19  ;;  %p166_p7 = scmp.lt.s32.totalorder %s160_s19, %s160_s19 }
  0x10   :  { %p167_p8 = por %p166_p7, %p165_p6 }
  0x12   :  { %p168_p9 = pnand %p167_p8, %p161_p5 }
  0x14   :  { %171 = shalt.err (!%p168_p9)
}
  0x15   :  { %20 = dma.hbm_to_vmem [thread:$0]  %s254_s0, 128, %s18_s15, [#allocation3]  }
  0x16   :  { %s220_s22 = smov [#allocation7]  }
  0x17   :  { %s37_s23 = sshll.u32 %s220_s22, 4  ;;  %s38_s23 = int_to_ptr.vmem [resolvable:$true] %s37_s23 }
  0x18   :  { %s180_s24 = scalar_lea.vmem %s38_s23, 128  ;;  %p185_p11 = scmp.lt.s32.totalorder %s38_s23, %s38_s23 }
  0x19   :  { %p181_p10 = scmp.ne.s32.totalorder %s38_s23, %s180_s24  ;;  %p186_p12 = scmp.lt.s32.totalorder %s180_s24, %s180_s24 }
  0x1b   :  { %p187_p13 = por %p186_p12, %p185_p11 }
  0x1d   :  { %p188_p0 = pnand %p187_p13, %p181_p10 }
  0x1f   :  { %191 = shalt.err (!%p188_p0)
}
  0x20   :  { %40 = dma.hbm_to_vmem [thread:$0]  %s256_s2, 128, %s38_s23, [#allocation6]  }
  0x21   :  { %212 = dma.done.wait [#allocation3], 128  }
  0x22   :  { %213 = vsyncadd [#allocation3], 4294967168 }
  0x23   :  { %214 = dma.done.wait [#allocation6], 256  }
  0x24   :  { %215 = vsyncadd [#allocation6], 4294967040  ;;  %v52_v0 = vld [vmem:[#allocation7] sm:$0xff]  ;;  %v51_v1 = vld [vmem:[#allocation5] sm:$0xff]  ;;  %s221_s30 = smov [#allocation8]  }
  0x25   :  { %v50_v2 = vld [vmem:[#allocation2] sm:$0xff]  ;;  %55 = vadd.xlane.f32.xlu0 %v52_v0  ;;  %v54_v3 = vmul.f32 %v52_v0, %v51_v1  ;;  %s106_s4 = sshll.u32 %s221_s30, 4  ;;  %s107_s4 = int_to_ptr.vmem [resolvable:$true] %s106_s4 }
  0x26   :  { %v53_v4 = vmul.f32 %v52_v0, %v50_v2  ;;  %s192_s5 = scalar_lea.vmem %s107_s4, 128  ;;  %p197_p2 = scmp.lt.s32.totalorder %s107_s4, %s107_s4 }
  0x27   :  { %77 = vadd.xlane.f32.xlu1 %v54_v3  ;;  %p193_p1 = scmp.ne.s32.totalorder %s107_s4, %s192_s5  ;;  %p198_p3 = scmp.lt.s32.totalorder %s192_s5, %s192_s5 }
  0x29   :  { %67 = vadd.xlane.f32.xlu0 %v53_v4  ;;  %p199_p4 = por %p198_p3, %p197_p2 }
  0x2b   :  { %p200_p5 = pnand %p199_p4, %p193_p1 }
  0xae   :  { %v56_v5 = vpop.xlane.xlu0 %55 }
  0xaf   :  { %v57_v6 = vrot.slane %v56_v5, 4 }
  0xb0   :  { %v78_v13 = vpop.xlane.xlu1 %77 }
  0xb1   :  { %v58_v7 = vadd.f32 %v57_v6, %v56_v5  ;;  %v79_v15 = vrot.slane %v78_v13, 4 }
  0xb2   :  { %v68_v12 = vpop.xlane.xlu0 %67 }
  0xb3   :  { %v59_v8 = vrot.slane %v58_v7, 2  ;;  %v69_v14 = vrot.slane %v68_v12, 4  ;;  %v80_v17 = vadd.f32 %v79_v15, %v78_v13 }
  0xb5   :  { %v60_v9 = vadd.f32 %v59_v8, %v58_v7  ;;  %v70_v16 = vadd.f32 %v69_v14, %v68_v12  ;;  %v81_v20 = vrot.slane %v80_v17, 2 }
  0xb7   :  { %v61_v10 = vrot.slane %v60_v9, 1  ;;  %v71_v19 = vrot.slane %v70_v16, 2  ;;  %v82_v22 = vadd.f32 %v81_v20, %v80_v17 }
  0xb9   :  { %v62_v11 = vadd.f32 %v61_v10, %v60_v9  ;;  %v72_v21 = vadd.f32 %v71_v19, %v70_v16  ;;  %v83_v24 = vrot.slane %v82_v22, 1 }
  0xbb   :  { %116 = vpush %v62_v11  ;;  %v73_v23 = vrot.slane %v72_v21, 1  ;;  %v84_v27 = vadd.f32 %v83_v24, %v82_v22 }
  0xbd   :  { %v74_v26 = vadd.f32 %v73_v23, %v72_v21 }
  0xec   :  { %s117_s0 = spop %116 }
  0xed   :  { %v64_v18 = vstv %s117_s0 }
  0xee   :  { %128 = vrcp.f32 %v64_v18 }
  0xfb   :  { %v129_v25 = vpop.eup %128 }
  0xfc   :  { %118 = vpush %v129_v25 }
  0xfd   :  { %120 = vpush %v74_v26 }
  0xfe   :  { %122 = vpush %v84_v27 }
 0x12d   :  { %s119_s2 = spop %118 }
 0x12e   :  { %s121_s26 = spop %120 }
 0x12f   :  { %s76_s27 = smul.f32 %s121_s26, %s119_s2  ;;  %s123_s28 = spop %122 }
 0x130   :  { %s86_s29 = smul.f32 %s123_s28, %s119_s2 }
 0x131   :  { %v87_v28 = vstv %s76_s27 }
 0x132   :  { %v88_v29 = vsub.f32 %v53_v4, %v87_v28  ;;  %v90_v30 = vstv %s86_s29 }
 0x133   :  { %v91_v31 = vsub.f32 %v54_v3, %v90_v30 }
 0x134   :  { %v89_v32 = vmul.f32 %v88_v29, %v52_v0 }
 0x135   :  { %v92_v33 = vmul.f32 %v91_v31, %v52_v0 }
 0x137   :  { %v93_v34 = vmul.f32 %v92_v33, %v89_v32 }
 0x139   :  { %v95_v35 = vand.u32 2147483647, %v93_v34  ;;  %v94_v37 = vadd.f32 1e-08, %v93_v34 }
 0x13b   :  { %v96_v36 = vadd.f32 1e-08, %v95_v35 }
 0x13d   :  { %130 = vrcp.f32 %v96_v36 }
 0x14a   :  { %v131_v38 = vpop.eup %130 }
 0x14b   :  { %v98_v39 = vmul.f32 %v131_v38, %v94_v37 }
 0x14d   :  { %99 = vst [vmem:[#allocation8] sm:$0xff] %v98_v39 }
 0x14e   :  { %203 = shalt.err (!%p200_p5)
}
 0x14f   :  { %109 = dma.vmem_to_hbm [thread:$0]  %s107_s4, 128, %s257_s3, [#allocation4]  }
 0x150   :  { %216 = dma.done.wait [#allocation4], 128  }
 0x151   :  { %217 = vsyncadd [#allocation4], 4294967168 }
 0x152   :  { %113 = vsyncpa [#allocation3], 1 }
 0x153   :  { %114 = vsyncpa [#allocation6], 1 }
 0x154   :  { %115 = vsyncpa [#allocation4], 1 }

</bundles_post_ra>
